<compile_context>
chip_gen: v5e
topology: v5e:2x2
jax: 0.10.0
libtpu: 0.0.40
codegen_flags: <defaults>
</compile_context>

<pallas_src>
import functools

import jax
import jax.numpy as jnp
from jax import lax
from jax.experimental import pallas as pl
from jax.experimental.pallas import tpu as pltpu


def _attention_kernel(q_ref, ref_ref, w_ref, v_ref, e_out_ref, logits_ref, *,
                      use_tanh, C, tb):
    """One grid step = a (TB batch rows) x (TL source positions) block.

    q_ref:      (TB, D)      pre-projected queries (lane-dense rows)
    ref_ref:    (TL, TB, D)  encoder states in their native (L, B, D) layout
    w_ref:      (D, D)       Conv1d(k=1) weight (out_ch, in_ch)
    v_ref:      (D, 1)       V parameter as a column
    e_out_ref:  (TB, D, TL)  projected refs (torch's (B, D, L) output layout)
    logits_ref: (TB, TL)     attention logits
    """
    d = w_ref.shape[0]
    tl = ref_ref.shape[0]

    w = w_ref[...]                                      # (D, D), loaded once
    q_cols = jnp.transpose(q_ref[...])                  # (D, TB), one tiny transpose
    v_bcast = jnp.broadcast_to(v_ref[...], (d, tl))     # hoisted V broadcast (D, TL)

    u_rows = []
    for b in range(tb):                                 # static loop, tb <= 8
        r_b = ref_ref[:, b, :]                          # (TL, D), native-layout row
        # 1x1 conv == matmul; contracting r's last dim gives the MXU output
        # directly in the (D, TL) orientation of the e output (on-chip relayout).
        e_b = lax.dot_general(w, r_b, (((1,), (1,)), ((), ())),
                              preferred_element_type=jnp.float32)   # (D, TL)
        # tanh(q + e): q is a (D, 1) column, lane-broadcast over TL
        t_b = jnp.tanh(q_cols[:, b:b + 1] + e_b)        # (D, TL)
        # u[l] = sum_d V[d] * t[d, l] -- VPU multiply + sublane (XLU) reduce
        u_rows.append(jnp.sum(v_bcast * t_b, axis=0, keepdims=True))  # (1, TL)
        e_out_ref[b] = e_b.astype(e_out_ref.dtype)      # dense (D, TL) store

    u = jnp.concatenate(u_rows, axis=0) if tb > 1 else u_rows[0]      # (TB, TL)
    if use_tanh:
        u = C * jnp.tanh(u)
    logits_ref[...] = u.astype(logits_ref.dtype)        # one dense (TB, TL) store


def attention_forward(ref, query, w_query, w_ref, v, *, use_tanh=False, C=10.0):
    """Pallas wrapper reproducing Attention.forward.

    Args:
      ref:     (sourceL, batch, dim)  float32 encoder states
      query:   (batch, dim)           float32 decoder state
      w_query: (dim, dim)             nn.Linear weight (out, in)
      w_ref:   (dim, dim, 1)          nn.Conv1d weight (out, in, k=1)
      v:       (dim,)                 the V parameter

    Returns:
      e:      (batch, dim, sourceL)
      logits: (batch, sourceL)
    """
    L, B, D = ref.shape

    # Hoisted query projection: one small XLA matmul.
    q_proj = query @ jnp.transpose(w_query)             # (B, D)
    w_r = w_ref[:, :, 0]                                # (D, D)
    v_col = v.reshape(D, 1)                             # (D, 1)

    def cdiv(a, b):
        return -(-a // b)

    # ---- tile selection ----------------------------------------------------
    TB = B if B <= 8 else 8
    TL = L if L <= 512 else 512                         # full L, or multiple of 128

    # Keep the double-buffered ref + e blocks inside ~12 MiB so the kernel fits
    # the default scoped-VMEM budget on every generation (incl. v7x's 64 MiB).
    def blk_bytes(tl):
        return 2 * 2 * tl * TB * D * 4                  # 2 arrays x 2 buffers x f32
    while TL > 128 and blk_bytes(TL) > 12 * 1024 * 1024:
        TL = max(128, ((TL // 2) + 127) // 128 * 128)

    # v7x megacore: if the batch axis has a single block, split L so the
    # parallel grid still has >= 2 blocks.
    if cdiv(B, TB) == 1 and cdiv(L, TL) == 1 and L >= 256:
        TL = ((cdiv(L, 2) + 127) // 128) * 128

    grid = (cdiv(B, TB), cdiv(L, TL))

    kernel = functools.partial(_attention_kernel, use_tanh=use_tanh, C=float(C),
                               tb=TB)

    e, logits = pl.pallas_call(
        kernel,
        out_shape=(
            jax.ShapeDtypeStruct((B, D, L), jnp.float32),
            jax.ShapeDtypeStruct((B, L), jnp.float32),
        ),
        grid_spec=pltpu.PrefetchScalarGridSpec(
            num_scalar_prefetch=0,
            grid=grid,
            in_specs=[
                pl.BlockSpec((TB, D), lambda ib, il: (ib, 0)),           # q_proj
                pl.BlockSpec((TL, TB, D), lambda ib, il: (il, ib, 0)),   # ref (native L,B,D)
                pl.BlockSpec((D, D), lambda ib, il: (0, 0)),             # W_ref (1x1 conv)
                pl.BlockSpec((D, 1), lambda ib, il: (0, 0)),             # V column
            ],
            out_specs=[
                pl.BlockSpec((TB, D, TL), lambda ib, il: (ib, 0, il)),   # e (B, D, L)
                pl.BlockSpec((TB, TL), lambda ib, il: (ib, il)),         # logits (B, L)
            ],
        ),
        compiler_params=pltpu.CompilerParams(
            dimension_semantics=("parallel", "parallel"),
            vmem_limit_bytes=32 * 1024 * 1024,
        ),
    )(q_proj, ref, w_r, v_col)

    return e, logits


def _reference_forward(ref, query, w_query, w_ref, v, *, use_tanh=False, C=10.0):
    """Pure-JAX reference mirroring the PyTorch code line by line."""
    ref_p = jnp.transpose(ref, (1, 2, 0))                       # (B, D, L)
    q = query @ w_query.T                                       # (B, D)
    e = jnp.einsum('oi,bil->bol', w_ref[:, :, 0], ref_p)        # (B, D, L)
    expanded_q = q[:, :, None]                                  # (B, D, 1)
    u = jnp.einsum('d,bdl->bl', v, jnp.tanh(expanded_q + e))    # (B, L)
    logits = C * jnp.tanh(u) if use_tanh else u
    return e, logits


if __name__ == "__main__":
    key = jax.random.PRNGKey(0)
    k_ref, k_q, k_wq, k_wr, k_v = jax.random.split(key, 5)

    batch, dim, sourceL = 2, 32, 8
    C = 10.0

    # Deterministic synthetic parameters (shapes follow the module __init__).
    ref = jax.random.normal(k_ref, (sourceL, batch, dim), dtype=jnp.float32)
    query = jax.random.normal(k_q, (batch, dim), dtype=jnp.float32)
    w_query = jax.random.normal(k_wq, (dim, dim), dtype=jnp.float32) * 0.1
    w_ref = jax.random.normal(k_wr, (dim, dim, 1), dtype=jnp.float32) * 0.1
    v = jax.random.uniform(k_v, (dim,), dtype=jnp.float32) - 0.5

    for use_tanh in (False, True):
        e, logits = attention_forward(ref, query, w_query, w_ref, v,
                                      use_tanh=use_tanh, C=C)
        jax.block_until_ready((e, logits))

        e_ref, logits_ref = _reference_forward(ref, query, w_query, w_ref, v,
                                               use_tanh=use_tanh, C=C)

        assert e.shape == (batch, dim, sourceL)
        assert logits.shape == (batch, sourceL)
        assert jnp.allclose(e, e_ref, atol=1e-5, rtol=1e-5)
        assert jnp.allclose(logits, logits_ref, atol=1e-5, rtol=1e-5)

    print("KERNEL_OK")
</pallas_src>

<mosaic_0001>
module attributes {stable_mosaic.version = 11 : i64} {
  func.func @_attention_kernel(%arg0: i32, %arg1: i32, %arg2: memref<2x32xf32, #tpu.memory_space<vmem>>, %arg3: memref<8x2x32xf32, #tpu.memory_space<vmem>>, %arg4: memref<32x32xf32, #tpu.memory_space<vmem>>, %arg5: memref<32x1xf32, #tpu.memory_space<vmem>>, %arg6: memref<2x32x8xf32, #tpu.memory_space<vmem>>, %arg7: memref<2x8xf32, #tpu.memory_space<vmem>>) attributes {dimension_semantics = [#tpu.dimension_semantics<parallel>, #tpu.dimension_semantics<parallel>], iteration_bounds = array<i64: 1, 1>, scalar_prefetch = 0 : i64, scratch_operands = 0 : i64, tpu.core_type = #tpu.core_type<tc>, window_params = [{transform_indices = @transform_0, window_bounds = array<i64: 2, 32>}, {transform_indices = @transform_1, window_bounds = array<i64: 8, 2, 32>}, {pipeline_mode = #tpu.pipeline_mode<synchronous>, transform_indices = @transform_2, window_bounds = array<i64: 32, 32>}, {pipeline_mode = #tpu.pipeline_mode<synchronous>, transform_indices = @transform_3, window_bounds = array<i64: 32, 1>}, {transform_indices = @transform_4, window_bounds = array<i64: 2, 32, 8>}, {transform_indices = @transform_5, window_bounds = array<i64: 2, 8>}]} {
    %c0 = arith.constant 0 : index
    %c0_0 = arith.constant 0 : index
    %0 = vector.load %arg4[%c0, %c0_0] : memref<32x32xf32, #tpu.memory_space<vmem>>, vector<32x32xf32>
    %c0_1 = arith.constant 0 : index
    %c0_2 = arith.constant 0 : index
    %1 = vector.load %arg2[%c0_1, %c0_2] : memref<2x32xf32, #tpu.memory_space<vmem>>, vector<2x32xf32>
    %2 = tpu.transpose %1, [1, 0] : vector<2x32xf32> -> vector<32x2xf32>
    %c0_3 = arith.constant 0 : index
    %c0_4 = arith.constant 0 : index
    %3 = vector.load %arg5[%c0_3, %c0_4] : memref<32x1xf32, #tpu.memory_space<vmem>>, vector<32x1xf32>
    %4 = vector.shape_cast %3 : vector<32x1xf32> to vector<32x1xf32>
    %5 = vector.broadcast %4 : vector<32x1xf32> to vector<32x8xf32>
    %c0_5 = arith.constant 0 : index
    %c0_6 = arith.constant 0 : index
    %c0_7 = arith.constant 0 : index
    %6 = vector.load %arg3[%c0_5, %c0_6, %c0_7] : memref<8x2x32xf32, #tpu.memory_space<vmem>>, vector<8x1x32xf32>
    %7 = vector.shape_cast %6 : vector<8x1x32xf32> to vector<8x32xf32>
    %cst = arith.constant dense<0.000000e+00> : vector<32x8xf32>
    %8 = tpu.matmul %0, %7, %cst {dimension_numbers = #tpu.dot_dimension_numbers<[1], [1], [0], [0], [0, 0, 1, 0], [], []>} : vector<32x32xf32>, vector<8x32xf32>, vector<32x8xf32> -> vector<32x8xf32>
    %9 = vector.extract_strided_slice %2 {offsets = [0, 0], sizes = [32, 1], strides = [1, 1]} : vector<32x2xf32> to vector<32x1xf32>
    %10 = vector.broadcast %9 : vector<32x1xf32> to vector<32x8xf32>
    %11 = arith.addf %10, %8 : vector<32x8xf32>
    %12 = math.tanh %11 : vector<32x8xf32>
    %13 = arith.mulf %5, %12 : vector<32x8xf32>
    %cst_8 = arith.constant dense<0.000000e+00> : vector<8xf32>
    %14 = vector.multi_reduction <add>, %13, %cst_8 [0] : vector<32x8xf32> to vector<8xf32>
    %15 = vector.shape_cast %14 : vector<8xf32> to vector<1x8xf32>
    %c0_9 = arith.constant 0 : index
    %c0_10 = arith.constant 0 : index
    %c0_11 = arith.constant 0 : index
    %16 = vector.load %arg6[%c0_9, %c0_10, %c0_11] : memref<2x32x8xf32, #tpu.memory_space<vmem>>, vector<1x32x8xf32>
    %17 = vector.shape_cast %16 : vector<1x32x8xf32> to vector<32x8xf32>
    %18 = vector.shape_cast %8 : vector<32x8xf32> to vector<1x32x8xf32>
    tpu.vector_store %arg6[%c0_9, %c0_10, %c0_11], %18 {strides = array<i32>} : memref<2x32x8xf32, #tpu.memory_space<vmem>>, vector<1x32x8xf32>,
    %c0_12 = arith.constant 0 : index
    %c1 = arith.constant 1 : index
    %c0_13 = arith.constant 0 : index
    %19 = vector.load %arg3[%c0_12, %c1, %c0_13] : memref<8x2x32xf32, #tpu.memory_space<vmem>>, vector<8x1x32xf32>
    %20 = vector.shape_cast %19 : vector<8x1x32xf32> to vector<8x32xf32>
    %cst_14 = arith.constant dense<0.000000e+00> : vector<32x8xf32>
    %21 = tpu.matmul %0, %20, %cst_14 {dimension_numbers = #tpu.dot_dimension_numbers<[1], [1], [0], [0], [0, 0, 1, 0], [], []>} : vector<32x32xf32>, vector<8x32xf32>, vector<32x8xf32> -> vector<32x8xf32>
    %22 = vector.extract_strided_slice %2 {offsets = [0, 1], sizes = [32, 1], strides = [1, 1]} : vector<32x2xf32> to vector<32x1xf32>
    %23 = vector.broadcast %22 : vector<32x1xf32> to vector<32x8xf32>
    %24 = arith.addf %23, %21 : vector<32x8xf32>
    %25 = math.tanh %24 : vector<32x8xf32>
    %26 = arith.mulf %5, %25 : vector<32x8xf32>
    %cst_15 = arith.constant dense<0.000000e+00> : vector<8xf32>
    %27 = vector.multi_reduction <add>, %26, %cst_15 [0] : vector<32x8xf32> to vector<8xf32>
    %28 = vector.shape_cast %27 : vector<8xf32> to vector<1x8xf32>
    %c1_16 = arith.constant 1 : index
    %c0_17 = arith.constant 0 : index
    %c0_18 = arith.constant 0 : index
    %29 = vector.load %arg6[%c1_16, %c0_17, %c0_18] : memref<2x32x8xf32, #tpu.memory_space<vmem>>, vector<1x32x8xf32>
    %30 = vector.shape_cast %29 : vector<1x32x8xf32> to vector<32x8xf32>
    %31 = vector.shape_cast %21 : vector<32x8xf32> to vector<1x32x8xf32>
    tpu.vector_store %arg6[%c1_16, %c0_17, %c0_18], %31 {strides = array<i32>} : memref<2x32x8xf32, #tpu.memory_space<vmem>>, vector<1x32x8xf32>,
    %32 = tpu.concatenate %15, %28 in 0 : vector<1x8xf32>, vector<1x8xf32> -> vector<2x8xf32>
    %c0_19 = arith.constant 0 : index
    %c0_20 = arith.constant 0 : index
    %33 = vector.load %arg7[%c0_19, %c0_20] : memref<2x8xf32, #tpu.memory_space<vmem>>, vector<2x8xf32>
    tpu.vector_store %arg7[%c0_19, %c0_20], %32 {strides = array<i32>} : memref<2x8xf32, #tpu.memory_space<vmem>>, vector<2x8xf32>,
    return
  }
  func.func @transform_0(%arg0: i32, %arg1: i32) -> (i32, i32) {
    %c0_i32 = arith.constant 0 : i32
    %c0_i32_0 = arith.constant 0 : i32
    return %arg0, %c0_i32 : i32, i32
  }
  func.func @transform_1(%arg0: i32, %arg1: i32) -> (i32, i32, i32) {
    %c0_i32 = arith.constant 0 : i32
    %c0_i32_0 = arith.constant 0 : i32
    return %arg1, %arg0, %c0_i32 : i32, i32, i32
  }
  func.func @transform_2(%arg0: i32, %arg1: i32) -> (i32, i32) {
    %c0_i32 = arith.constant 0 : i32
    %c0_i32_0 = arith.constant 0 : i32
    %c0_i32_1 = arith.constant 0 : i32
    return %c0_i32, %c0_i32_0 : i32, i32
  }
  func.func @transform_3(%arg0: i32, %arg1: i32) -> (i32, i32) {
    %c0_i32 = arith.constant 0 : i32
    %c0_i32_0 = arith.constant 0 : i32
    %c0_i32_1 = arith.constant 0 : i32
    return %c0_i32, %c0_i32_0 : i32, i32
  }
  func.func @transform_4(%arg0: i32, %arg1: i32) -> (i32, i32, i32) {
    %c0_i32 = arith.constant 0 : i32
    %c0_i32_0 = arith.constant 0 : i32
    return %arg0, %c0_i32, %arg1 : i32, i32, i32
  }
  func.func @transform_5(%arg0: i32, %arg1: i32) -> (i32, i32) {
    %c0_i32 = arith.constant 0 : i32
    return %arg0, %arg1 : i32, i32
  }
}

</mosaic_0001>

<bundles_post_ra>
// kernel: tpu_custom_call.1
= control target key start
LH: loop header
LB: loop body
LE: loop exit
PB: predicated region body
PF: predicated region fallthrough
CT: control target
= control target key end

     0   :  { %11 = vsyncpa [#allocation3], 0  ;;  %s637_s0 = inlined_call_operand.hbm [shape: f32[2,32], index: 0, kind: input, shape index: {}]   ;;  %s638_s1 = inlined_call_operand.hbm [shape: f32[8,2,32], index: 1, kind: input, shape index: {}]   ;;  %s639_s2 = inlined_call_operand.vmem [shape: f32[32,32], index: 2, kind: input, shape index: {}]   ;;  %s640_s3 = inlined_call_operand.vmem [shape: f32[32,1], index: 3, kind: input, shape index: {}]   ;;  %s641_s4 = inlined_call_operand.vmem [shape: f32[2,32,8], index: 4, kind: output, shape index: {0}]   ;;  %s642_s5 = inlined_call_operand.hbm [shape: f32[2,8], index: 5, kind: output, shape index: {1}]  }
   0x1   :  { %12 = vsyncpa [#allocation6], 0 }
   0x2   :  { %13 = vsyncpa [#allocation4], 0  ;;  %s19_s20 = sshll.u32 %s637_s0, 4  ;;  %s498_s21 = smov [#allocation2]   ;;  %s20_s20 = int_to_ptr.hbm [resolvable:$true] %s19_s20 }
   0x3   :  { %s21_s22 = sshll.u32 %s498_s21, 4  ;;  %s29_s25 = sshll.u32 %s638_s1, 4  ;;  %s22_s22 = int_to_ptr.vmem [resolvable:$true] %s21_s22  ;;  %s30_s25 = int_to_ptr.hbm [resolvable:$true] %s29_s25 }
   0x4   :  { %24 = dma.hbm_to_vmem [thread:$0]  %s20_s20, 32, %s22_s22, [#allocation3]  }
   0x5   :  { %s499_s26 = smov [#allocation5]   ;;  %s500_s28 = smov 32  }
   0x6   :  { %s31_s27 = sshll.u32 %s499_s26, 4  ;;  %s501_s29 = smov 2   ;;  %s32_s27 = int_to_ptr.vmem [resolvable:$true] %s31_s27 }
   0x7   :  { %37 = dma.hbm_to_vmem [thread:$0]  %s30_s25, 256, %s32_s27, [#allocation6], %s500_s28, %s500_s28, %s501_s29  }
   0x8   :  { %492 = dma.done.wait [#allocation3], 32  }
   0x9   :  { %493 = vsyncadd [#allocation3], 4294967264 }
   0xa   :  { %494 = dma.done.wait [#allocation6], 256  }
   0xb   :  { %495 = vsyncadd [#allocation6], 4294967040  ;;  %v502_v0 = vmov 0   ;;  %vm128_vm0 = vcmask 1041409   ;;  %vm131_vm1 = vcmask 1042434   ;;  %vm134_vm2 = vcmask 1043459  }
   0xc   :  { %400 = vset.pattern.permute.xlu1 %v502_v0  ;;  %v54_v1 = vld [vmem:[#allocation2] sm:$0x3]  ;;  %v242_v2 = vld [vmem:[#allocation5 + $0x1] sm:$0x1]  ;;  %v243_v3 = vld [vmem:[#allocation5 + $0x3] sm:$0x1] }
   0xd   :  { %55 = vxpose.xlu0.b32.start.end [1/1] (short) (narrow) %v54_v1, 32  ;;  %v244_v4 = vld [vmem:[#allocation5 + $0x5] sm:$0x1]  ;;  %v245_v5 = vld [vmem:[#allocation5 + $0x7] sm:$0x1]  ;;  %v258_v6 = vrot.slane %v243_v3, 7 }
   0xe   :  { %v246_v7 = vld [vmem:[#allocation5 + $0x9] sm:$0x1]  ;;  %v247_v8 = vld [vmem:[#allocation5 + $0xb] sm:$0x1]  ;;  %v248_v9 = vld [vmem:[#allocation5 + $0xd] sm:$0x1] }
   0xf   :  { %v249_v10 = vld [vmem:[#allocation5 + $0xf] sm:$0x1]  ;;  %v259_v11 = vsel %vm128_vm0, %v258_v6, %v242_v2  ;;  %v260_v12 = vrot.slane %v244_v4, 6  ;;  %v262_v13 = vrot.slane %v245_v5, 5  ;;  %v264_v14 = vrot.slane %v246_v7, 4  ;;  %v50_v24 = vld [vmem:[%s639_s2] sm:$0xff] }
  0x10   :  { %vm137_vm3 = vcmask 1044484   ;;  %v266_v15 = vrot.slane %v247_v8, 3  ;;  %vm140_vm4 = vcmask 1045509   ;;  %v268_v17 = vrot.slane %v248_v9, 2  ;;  %v52_v25 = vld [vmem:[%s639_s2 + $0x10] sm:$0xff]  ;;  %v51_v26 = vld [vmem:[%s639_s2 + $0x8] sm:$0xff] }
  0x11   :  { %v261_v16 = vsel %vm131_vm1, %v260_v12, %v259_v11  ;;  %vm143_vm5 = vcmask 1046534   ;;  %v270_v19 = vrot.slane %v249_v10, 1  ;;  %vm146_vm6 = vcmask 1047559   ;;  %v53_v27 = vld [vmem:[%s639_s2 + $0x18] sm:$0xff]  ;;  %v111_v28 = vld [vmem:[#allocation5] sm:$0x1] }
  0x12   :  { %v263_v18 = vsel %vm134_vm2, %v262_v13, %v261_v16  ;;  %vm148_vm7 = vcmask 261120   ;;  %v112_v29 = vld [vmem:[#allocation5 + $0x2] sm:$0x1]  ;;  %v113_v30 = vld [vmem:[#allocation5 + $0x4] sm:$0x1]  ;;  %v503_v44 = vmov 1  }
  0x13   :  { %v265_v20 = vsel %vm137_vm3, %v264_v14, %v263_v18  ;;  %v114_v31 = vld [vmem:[#allocation5 + $0x6] sm:$0x1]  ;;  %v115_v32 = vld [vmem:[#allocation5 + $0x8] sm:$0x1]  ;;  %v116_v33 = vld [vmem:[#allocation5 + $0xa] sm:$0x1]  ;;  %401 = vset.pattern.permute.xlu2 %v503_v44 }
  0x14   :  { %v267_v21 = vsel %vm140_vm4, %v266_v15, %v265_v20  ;;  %v117_v34 = vld [vmem:[#allocation5 + $0xc] sm:$0x1]  ;;  %v127_v35 = vrot.slane %v112_v29, 7  ;;  %v130_v36 = vrot.slane %v113_v30, 6  ;;  %v118_v37 = vld [vmem:[#allocation5 + $0xe] sm:$0x1] }
  0x15   :  { %v269_v22 = vsel %vm143_vm5, %v268_v17, %v267_v21  ;;  %v133_v38 = vrot.slane %v114_v31, 5  ;;  %v136_v39 = vrot.slane %v115_v32, 4  ;;  %v139_v41 = vrot.slane %v116_v33, 3  ;;  %v87_v51 = vld [vmem:[%s640_s3] sm:$0xff]  ;;  %v88_v56 = vld [vmem:[%s640_s3 + $0x8] sm:$0xff]  ;;  %v89_v57 = vld [vmem:[%s640_s3 + $0x10] sm:$0xff] }
  0x16   :  { %v271_v23 = vsel %vm146_vm6, %v270_v19, %v269_v22  ;;  %v129_v40 = vsel %vm128_vm0, %v127_v35, %v111_v28  ;;  %v142_v43 = vrot.slane %v117_v34, 2  ;;  %v145_v46 = vrot.slane %v118_v37, 1  ;;  %v90_v58 = vld [vmem:[%s640_s3 + $0x18] sm:$0xff]  ;;  %s362_s9 = sshll.u32 %s642_s5, 4  ;;  %s363_s9 = int_to_ptr.hbm [resolvable:$true] %s362_s9 }
  0x17   :  { %380 = vmatpush.xpose.msk.msra.mxu1 %vm148_vm7, %v271_v23  ;;  %390 = vmatpush.xpose.msk.msra.mxu3 %vm148_vm7, %v271_v23  ;;  %v132_v42 = vsel %vm131_vm1, %v130_v36, %v129_v40  ;;  %vm224_vm8 = vcmask 64512   ;;  %vm349_vm9 = vcmask 1040384   ;;  %vm351_vm10 = vcmask 58368  }
  0x18   :  { %v135_v45 = vsel %vm134_vm2, %v133_v38, %v132_v42 }
  0x19   :  { %v138_v47 = vsel %vm137_vm3, %v136_v39, %v135_v45 }
  0x1a   :  { %381 = vmatmul.msk.f32.vlgmr.msra.gmra.mxu1 %vm148_vm7, %v50_v24  ;;  %383 = vmatmul.msk.f32.vlgmr.msra.gmra.mxu3 %vm148_vm7, %v52_v25  ;;  %v141_v48 = vsel %vm140_vm4, %v139_v41, %v138_v47 }
  0x1b   :  { %v144_v49 = vsel %vm143_vm5, %v142_v43, %v141_v48 }
  0x1c   :  { %v147_v50 = vsel %vm146_vm6, %v145_v46, %v144_v49 }
  0x1d   :  { %375 = vmatpush.xpose.msk.msra.mxu0 %vm148_vm7, %v147_v50  ;;  %389 = vmatpush.xpose.msk.msra.mxu2 %vm148_vm7, %v147_v50 }
  0x20   :  { %376 = vmatmul.msk.f32.vlgmr.msra.gmra.mxu0 %vm148_vm7, %v50_v24  ;;  %378 = vmatmul.msk.f32.vlgmr.msra.gmra.mxu2 %vm148_vm7, %v52_v25 }
  0x22   :  { %382 = vmatmul.msk.f32.gmra.mxu1 %vm148_vm7, %v51_v26  ;;  %384 = vmatmul.msk.f32.gmra.mxu3 %vm148_vm7, %v53_v27 }
  0x28   :  { %377 = vmatmul.msk.f32.gmra.mxu0 %vm148_vm7, %v51_v26  ;;  %379 = vmatmul.msk.f32.gmra.mxu2 %vm148_vm7, %v53_v27 }
  0x74   :  { %399 = vset.pattern.permute.xlu0 %v502_v0 }
  0x93   :  { %93 = vperm.xlu0 %399, %v87_v51  }
  0x97   :  { %v291_v59 = vpop.f32.mrf.mxu1 }
  0x98   :  { %385 = vst.msk [vmem:[%s641_s4 + $0x20] sm:$0xff] %vm224_vm8, %v291_v59 }
  0x9b   :  { %403 = vset.pattern.permute.xlu0 %v503_v44 }
  0x9d   :  { %v297_v61 = vpop.f32.mrf.mxu3  ;;  %v180_v62 = vpop.f32.mrf.mxu0 }
  0x9e   :  { %387 = vst.msk [vmem:[%s641_s4 + $0x30] sm:$0xff] %vm224_vm8, %v297_v61 }
  0x9f   :  { %v294_v60 = vpop.f32.mrf.mxu1  ;;  %238 = vst.msk [vmem:[%s641_s4] sm:$0xff] %vm224_vm8, %v180_v62 }
  0xa0   :  { %386 = vst.msk [vmem:[%s641_s4 + $0x28] sm:$0xff] %vm224_vm8, %v294_v60 }
  0xa3   :  { %v186_v1 = vpop.f32.mrf.mxu2 }
  0xa4   :  { %240 = vst.msk [vmem:[%s641_s4 + $0x10] sm:$0xff] %vm224_vm8, %v186_v1 }
  0xa5   :  { %v300_v63 = vpop.f32.mrf.mxu3 }
  0xa6   :  { %388 = vst.msk [vmem:[%s641_s4 + $0x38] sm:$0xff] %vm224_vm8, %v300_v63 }
  0xab   :  { %v189_v3 = vpop.f32.mrf.mxu2 }
  0xac   :  { %241 = vst.msk [vmem:[%s641_s4 + $0x18] sm:$0xff] %vm224_vm8, %v189_v3 }
  0xb1   :  { %v71_v52 = vpop.trf.xlu0 }
  0xb2   :  { %304 = vperm.xlu2 %401, %v71_v52   ;;  %194 = vperm.xlu1 %400, %v71_v52  }
  0xb9   :  { %v72_v53 = vpop.trf.xlu0 }
  0xba   :  { %308 = vperm.xlu2 %401, %v72_v53   ;;  %199 = vperm.xlu1 %400, %v72_v53  }
  0xc1   :  { %v73_v54 = vpop.trf.xlu0 }
  0xc2   :  { %312 = vperm.xlu2 %401, %v73_v54   ;;  %204 = vperm.xlu1 %400, %v73_v54  }
  0xc9   :  { %v74_v55 = vpop.trf.xlu0 }
  0xca   :  { %316 = vperm.xlu2 %401, %v74_v55   ;;  %209 = vperm.xlu1 %400, %v74_v55  }
  0xd2   :  { %402 = vset.pattern.permute.xlu2 %v502_v0  ;;  %98 = vperm.xlu1 %400, %v88_v56   ;;  %v183_v0 = vpop.f32.mrf.mxu0 }
  0xd3   :  { %103 = vperm.xlu2 %402, %v89_v57   ;;  %239 = vst.msk [vmem:[%s641_s4 + $0x8] sm:$0xff] %vm224_vm8, %v183_v0  ;;  %s504_s4 = smov [#allocation7]  }
  0xd4   :  { %s360_s6 = sshll.u32 %s504_s4, 4  ;;  %s361_s6 = int_to_ptr.vmem [resolvable:$true] %s360_s6 }
  0xda   :  { %108 = vperm.xlu1 %400, %v90_v58  }
 0x105   :  { %v94_v18 = vpop.permute.xlu0 %93 }
 0x10c   :  { %v305_v2 = vpop.permute.xlu2 %304 }
 0x10d   :  { %v319_v9 = vadd.f32 %v305_v2, %v291_v59 }
 0x10f   :  { %404 = vtanh.f32 %v319_v9 }
 0x114   :  { %v309_v4 = vpop.permute.xlu2 %308 }
 0x115   :  { %v320_v10 = vadd.f32 %v309_v4, %v294_v60  ;;  %v405_v17 = vpop.eup %404 }
 0x116   :  { %v327_v25 = vmul.f32 %v405_v17, %v94_v18 }
 0x117   :  { %406 = vtanh.f32 %v320_v10 }
 0x118   :  { %v331_v33 = vsel %vm224_vm8, %v327_v25, 0.0 }
 0x11c   :  { %v313_v7 = vpop.permute.xlu2 %312 }
 0x11d   :  { %v321_v13 = vadd.f32 %v313_v7, %v297_v61  ;;  %v407_v20 = vpop.eup %406 }
 0x124   :  { %v195_v5 = vpop.permute.xlu1 %194  ;;  %v317_v11 = vpop.permute.xlu2 %316 }
 0x125   :  { %v212_v12 = vadd.f32 %v195_v5, %v180_v62  ;;  %v322_v19 = vadd.f32 %v317_v11, %v300_v63 }
 0x127   :  { %408 = vtanh.f32 %v212_v12 }
 0x128   :  { %410 = vtanh.f32 %v321_v13 }
 0x12c   :  { %v200_v6 = vpop.permute.xlu1 %199 }
 0x12d   :  { %v213_v14 = vadd.f32 %v200_v6, %v183_v0  ;;  %v409_v21 = vpop.eup %408  ;;  %v104_v22 = vpop.permute.xlu2 %103 }
 0x12e   :  { %v411_v24 = vpop.eup %410  ;;  %v220_v29 = vmul.f32 %v409_v21, %v94_v18 }
 0x12f   :  { %412 = vtanh.f32 %v213_v14  ;;  %v329_v28 = vmul.f32 %v411_v24, %v104_v22 }
 0x130   :  { %v225_v38 = vsel %vm224_vm8, %v220_v29, 0.0 }
 0x131   :  { %v334_v37 = vsel %vm224_vm8, %v329_v28, 0.0 }
 0x134   :  { %v205_v8 = vpop.permute.xlu1 %204 }
 0x135   :  { %v214_v15 = vadd.f32 %v205_v8, %v186_v1  ;;  %v413_v26 = vpop.eup %412 }
 0x137   :  { %414 = vtanh.f32 %v214_v15 }
 0x138   :  { %416 = vtanh.f32 %v322_v19 }
 0x13c   :  { %v210_v16 = vpop.permute.xlu1 %209 }
 0x13d   :  { %v215_v23 = vadd.f32 %v210_v16, %v189_v3  ;;  %v415_v32 = vpop.eup %414 }
 0x13e   :  { %v222_v39 = vmul.f32 %v415_v32, %v104_v22  ;;  %v417_v40 = vpop.eup %416 }
 0x13f   :  { %418 = vtanh.f32 %v215_v23 }
 0x140   :  { %v228_v46 = vsel %vm224_vm8, %v222_v39, 0.0 }
 0x144   :  { %v99_v27 = vpop.permute.xlu1 %98 }
 0x145   :  { %v221_v30 = vmul.f32 %v413_v26, %v99_v27  ;;  %v328_v31 = vmul.f32 %v407_v20, %v99_v27  ;;  %v419_v43 = vpop.eup %418 }
 0x147   :  { %v226_v34 = vsel %vm224_vm8, %v221_v30, 0.0  ;;  %v332_v35 = vsel %vm224_vm8, %v328_v31, 0.0 }
 0x148   :  { %v333_v36 = vadd.f32 %v332_v35, %v331_v33  ;;  %v227_v41 = vadd.f32 %v226_v34, %v225_v38 }
 0x14a   :  { %v335_v42 = vadd.f32 %v334_v37, %v333_v36  ;;  %v229_v48 = vadd.f32 %v228_v46, %v227_v41 }
 0x14c   :  { %v109_v44 = vpop.permute.xlu1 %108 }
 0x14d   :  { %v223_v45 = vmul.f32 %v419_v43, %v109_v44  ;;  %v330_v47 = vmul.f32 %v417_v40, %v109_v44 }
 0x14f   :  { %v230_v49 = vsel %vm224_vm8, %v223_v45, 0.0  ;;  %v336_v50 = vsel %vm224_vm8, %v330_v47, 0.0 }
 0x150   :  { %v231_v51 = vadd.f32 %v230_v49, %v229_v48  ;;  %v337_v52 = vadd.f32 %v336_v50, %v335_v42 }
 0x152   :  { %v232_v53 = vrot.slane %v231_v51, 4  ;;  %v338_v54 = vrot.slane %v337_v52, 4 }
 0x154   :  { %v233_v55 = vadd.f32 %v232_v53, %v231_v51  ;;  %v339_v56 = vadd.f32 %v338_v54, %v337_v52 }
 0x156   :  { %v234_v57 = vrot.slane %v233_v55, 2  ;;  %v340_v58 = vrot.slane %v339_v56, 2 }
 0x158   :  { %v235_v59 = vadd.f32 %v234_v57, %v233_v55  ;;  %v341_v60 = vadd.f32 %v340_v58, %v339_v56 }
 0x15a   :  { %v236_v61 = vrot.slane %v235_v59, 1  ;;  %v342_v62 = vrot.slane %v341_v60, 1 }
 0x15c   :  { %v237_v63 = vadd.f32 %v236_v61, %v235_v59  ;;  %v343_v0 = vadd.f32 %v342_v62, %v341_v60 }
 0x15e   :  { %v350_v1 = vsel %vm349_vm9, %v237_v63, %v343_v0 }
 0x15f   :  { %352 = vst.msk [vmem:[#allocation7] sm:$0x3] %vm351_vm10, %v350_v1 }
 0x160   :  { %365 = dma.vmem_to_hbm [thread:$0]  %s361_s6, 32, %s363_s9, [#allocation4]  }
 0x161   :  { %496 = dma.done.wait [#allocation4], 32  }
 0x162   :  { %497 = vsyncadd [#allocation4], 4294967264 }
 0x163   :  { %372 = vsyncpa [#allocation3], 1 }
 0x164   :  { %373 = vsyncpa [#allocation6], 1 }
 0x165   :  { %374 = vsyncpa [#allocation4], 1 }

</bundles_post_ra>
